<compile_context>
chip_gen: v6e
topology: v6e:2x2x1
jax: 0.10.0
libtpu: 0.0.40
codegen_flags: <defaults>
</compile_context>

<pallas_src>
import jax
import jax.numpy as jnp
from jax.experimental import pallas as pl
from jax.experimental.pallas import tpu as pltpu


def mlp_kernel(x_ref, w1t_ref, gamma_ref, beta_ref, w2t_ref, b2_ref, o_ref, acc_ref):
    hi = pl.program_id(0)

    @pl.when(hi == 0)
    def _init():
        acc_ref[...] = jnp.zeros_like(acc_ref)

    # ---- Linear 1 (bias omitted: exactly cancelled by BN mean subtraction) ----
    # bf16 x bf16 -> f32 on the MXU.
    h = jnp.dot(x_ref[...], w1t_ref[...], preferred_element_type=jnp.float32)  # [B, tH]

    # ---- BatchNorm1d (training-mode batch stats, biased var, eps=1e-5), fused ----
    eps = 1e-5
    mean = jnp.mean(h, axis=0, keepdims=True)                                   # [1, tH]
    var = jnp.maximum(jnp.mean(h * h, axis=0, keepdims=True) - mean * mean, 0.0)
    scale = gamma_ref[...] * jax.lax.rsqrt(var + eps)                           # [1, tH]
    shift = beta_ref[...] - mean * scale
    # ---- fused affine + ReLU ----
    h_act = jnp.maximum(h * scale + shift, 0.0)

    # ---- Linear 2: partial product over this hidden tile, accumulate in f32 ----
    acc_ref[...] += jnp.dot(h_act.astype(jnp.bfloat16), w2t_ref[...],
                            preferred_element_type=jnp.float32)

    @pl.when(hi == pl.num_programs(0) - 1)
    def _finalize():
        o_ref[...] = (acc_ref[...] + b2_ref[...]).astype(o_ref.dtype)


def _round_up(n, m):
    return ((n + m - 1) // m) * m


@jax.jit
def mlp_forward(x, w1t, gamma, beta, w2t, b2):
    """MLP forward with training-mode BatchNorm1d.

    x:     [B, dim]          (float32)
    w1t:   [dim, hidden]     pre-transposed Linear1 weight (bias dropped: it is
                             exactly cancelled by BatchNorm mean subtraction)
    gamma: [hidden]          BatchNorm1d weight
    beta:  [hidden]          BatchNorm1d bias
    w2t:   [hidden, proj]    pre-transposed Linear2 weight
    b2:    [proj]            Linear2 bias
    """
    B, dim = x.shape
    hidden = w1t.shape[1]
    proj = w2t.shape[1]

    # Lane-dense padding of the contraction (dim) and output (proj) lane dims.
    dim_p = _round_up(dim, 128)
    proj_p = _round_up(proj, 128)

    # Hidden tile: full H per step for small H, 512 for realistic (4096) H.
    th = hidden if hidden <= 512 else 512
    hidden_p = _round_up(hidden, th)
    n_h = hidden_p // th

    # bf16 MXU operands; biases / BN params stay f32 and 2-D (lane-friendly).
    x_bf = jnp.pad(x, ((0, 0), (0, dim_p - dim))).astype(jnp.bfloat16)
    w1t_bf = jnp.pad(w1t, ((0, dim_p - dim), (0, hidden_p - hidden))).astype(jnp.bfloat16)
    w2t_bf = jnp.pad(w2t, ((0, hidden_p - hidden), (0, proj_p - proj))).astype(jnp.bfloat16)
    b2_2d = jnp.pad(b2, (0, proj_p - proj)).reshape(1, proj_p).astype(jnp.float32)
    gamma_2d = jnp.pad(gamma, (0, hidden_p - hidden),
                       constant_values=1.0).reshape(1, hidden_p).astype(jnp.float32)
    beta_2d = jnp.pad(beta, (0, hidden_p - hidden)).reshape(1, hidden_p).astype(jnp.float32)

    cost = pl.CostEstimate(
        flops=2 * B * dim_p * hidden_p + 2 * B * hidden_p * proj_p,
        transcendentals=hidden_p,                   # rsqrt per hidden feature
        bytes_accessed=(x_bf.size * 2 + w1t_bf.size * 2 + w2t_bf.size * 2
                        + (gamma_2d.size + beta_2d.size + b2_2d.size) * 4
                        + B * proj_p * 4),
    )

    out_p = pl.pallas_call(
        mlp_kernel,
        out_shape=jax.ShapeDtypeStruct((B, proj_p), x.dtype),
        grid=(n_h,),
        in_specs=[
            pl.BlockSpec((B, dim_p), lambda h: (0, 0)),      # x (full, reused each step)
            pl.BlockSpec((dim_p, th), lambda h: (0, h)),     # W1^T hidden tile
            pl.BlockSpec((1, th), lambda h: (0, h)),         # gamma tile
            pl.BlockSpec((1, th), lambda h: (0, h)),         # beta tile
            pl.BlockSpec((th, proj_p), lambda h: (h, 0)),    # W2^T hidden tile
            pl.BlockSpec((1, proj_p), lambda h: (0, 0)),     # b2
        ],
        out_specs=pl.BlockSpec((B, proj_p), lambda h: (0, 0)),  # resident across H
        scratch_shapes=[pltpu.VMEM((B, proj_p), jnp.float32)],  # f32 accumulator
        compiler_params=pltpu.CompilerParams(
            dimension_semantics=("arbitrary",),     # H is a reduction axis
        ),
        cost_estimate=cost,
    )(x_bf, w1t_bf, gamma_2d, beta_2d, w2t_bf, b2_2d)

    return out_p[:, :proj]


if __name__ == "__main__":
    # Small shapes consistent with the module: dim=32, hidden=128, projection=16
    B, dim, hidden, proj = 8, 32, 128, 16

    key = jax.random.PRNGKey(0)
    kx, kw1, kb1, kw2, kb2 = jax.random.split(key, 5)

    x = jax.random.normal(kx, (B, dim), dtype=jnp.float32)

    # PyTorch Linear default init: U(-1/sqrt(fan_in), 1/sqrt(fan_in))
    lim1 = 1.0 / (dim ** 0.5)
    w1 = jax.random.uniform(kw1, (hidden, dim), minval=-lim1, maxval=lim1, dtype=jnp.float32)
    b1 = jax.random.uniform(kb1, (hidden,), minval=-lim1, maxval=lim1, dtype=jnp.float32)

    gamma = jnp.ones((hidden,), dtype=jnp.float32)   # BatchNorm1d weight
    beta = jnp.zeros((hidden,), dtype=jnp.float32)   # BatchNorm1d bias

    lim2 = 1.0 / (hidden ** 0.5)
    w2 = jax.random.uniform(kw2, (proj, hidden), minval=-lim2, maxval=lim2, dtype=jnp.float32)
    b2 = jax.random.uniform(kb2, (proj,), minval=-lim2, maxval=lim2, dtype=jnp.float32)

    # Persistent pre-transposed weights (one-time layout change, outside the jit).
    w1t = w1.T                                       # [dim, hidden]
    w2t = w2.T                                       # [hidden, proj]

    out = mlp_forward(x, w1t, gamma, beta, w2t, b2)
    out = jax.block_until_ready(out)
    assert out.shape == (B, proj)

    # ---- Reference 1: bf16-MXU reference (same dtype policy, includes b1 to
    #      demonstrate that dropping it under training-mode BN is exact). ----
    hb = jnp.dot(x.astype(jnp.bfloat16), w1t.astype(jnp.bfloat16),
                 preferred_element_type=jnp.float32) + b1
    m = hb.mean(axis=0, keepdims=True)
    v = ((hb - m) ** 2).mean(axis=0, keepdims=True)
    hn = (hb - m) * jax.lax.rsqrt(v + 1e-5) * gamma + beta
    ref_bf16 = jnp.dot(jnp.maximum(hn, 0.0).astype(jnp.bfloat16),
                       w2t.astype(jnp.bfloat16),
                       preferred_element_type=jnp.float32) + b2
    assert jnp.allclose(out, ref_bf16, atol=5e-3, rtol=5e-3)

    # ---- Reference 2: pure f32 PyTorch-semantics reference (looser tolerance
    #      purely due to bf16 MXU operands). ----
    h = x @ w1.T + b1
    mean = h.mean(axis=0, keepdims=True)
    var = ((h - mean) ** 2).mean(axis=0, keepdims=True)
    h = (h - mean) / jnp.sqrt(var + 1e-5) * gamma + beta
    ref_f32 = jnp.maximum(h, 0.0) @ w2.T + b2
    assert jnp.allclose(out, ref_f32, atol=5e-2, rtol=5e-2)

    print("KERNEL_OK")
</pallas_src>

<mosaic_0001>
module attributes {stable_mosaic.version = 11 : i64} {
  func.func @mlp_kernel(%arg0: i32, %arg1: memref<8x128xbf16, #tpu.memory_space<vmem>>, %arg2: memref<128x128xbf16, #tpu.memory_space<vmem>>, %arg3: memref<1x128xf32, #tpu.memory_space<vmem>>, %arg4: memref<1x128xf32, #tpu.memory_space<vmem>>, %arg5: memref<128x128xbf16, #tpu.memory_space<vmem>>, %arg6: memref<1x128xf32, #tpu.memory_space<vmem>>, %arg7: memref<8x128xf32, #tpu.memory_space<vmem>>, %arg8: memref<8x128xf32, #tpu.memory_space<vmem>>) attributes {dimension_semantics = [#tpu.dimension_semantics<arbitrary>], iteration_bounds = array<i64: 1>, scalar_prefetch = 0 : i64, scratch_operands = 1 : i64, tpu.core_type = #tpu.core_type<tc>, window_params = [{pipeline_mode = #tpu.pipeline_mode<synchronous>, transform_indices = @transform_0, window_bounds = array<i64: 8, 128>}, {transform_indices = @transform_1, window_bounds = array<i64: 128, 128>}, {transform_indices = @transform_2, window_bounds = array<i64: 1, 128>}, {transform_indices = @transform_3, window_bounds = array<i64: 1, 128>}, {transform_indices = @transform_4, window_bounds = array<i64: 128, 128>}, {pipeline_mode = #tpu.pipeline_mode<synchronous>, transform_indices = @transform_5, window_bounds = array<i64: 1, 128>}, {pipeline_mode = #tpu.pipeline_mode<synchronous>, transform_indices = @transform_6, window_bounds = array<i64: 8, 128>}]} {
    %c0_i32 = arith.constant 0 : i32
    %0 = arith.cmpi eq, %arg0, %c0_i32 : i32
    %1 = arith.extui %0 : i1 to i32
    %c0_i32_0 = arith.constant 0 : i32
    %2 = arith.cmpi ne, %1, %c0_i32_0 : i32
    scf.if %2 {
      %cst_24 = arith.constant 0.000000e+00 : f32
      %42 = vector.broadcast %cst_24 : f32 to vector<8x128xf32>
      %c0_25 = arith.constant 0 : index
      %c0_26 = arith.constant 0 : index
      %43 = vector.load %arg8[%c0_25, %c0_26] : memref<8x128xf32, #tpu.memory_space<vmem>>, vector<8x128xf32>
      tpu.vector_store %arg8[%c0_25, %c0_26], %42 {strides = array<i32>} : memref<8x128xf32, #tpu.memory_space<vmem>>, vector<8x128xf32>,
    } else {
    }
    %c0 = arith.constant 0 : index
    %c0_1 = arith.constant 0 : index
    %3 = vector.load %arg1[%c0, %c0_1] : memref<8x128xbf16, #tpu.memory_space<vmem>>, vector<8x128xbf16>
    %c0_2 = arith.constant 0 : index
    %c0_3 = arith.constant 0 : index
    %4 = vector.load %arg2[%c0_2, %c0_3] : memref<128x128xbf16, #tpu.memory_space<vmem>>, vector<128x128xbf16>
    %cst = arith.constant dense<0.000000e+00> : vector<8x128xf32>
    %5 = tpu.matmul %3, %4, %cst {dimension_numbers = #tpu.dot_dimension_numbers<[1], [0], [0], [1], [0, 0, 1, 1], [], []>} : vector<8x128xbf16>, vector<128x128xbf16>, vector<8x128xf32> -> vector<8x128xf32>
    %cst_4 = arith.constant dense<0.000000e+00> : vector<128xf32>
    %6 = vector.multi_reduction <add>, %5, %cst_4 [0] : vector<8x128xf32> to vector<128xf32>
    %7 = vector.shape_cast %6 : vector<128xf32> to vector<1x128xf32>
    %cst_5 = arith.constant 8.000000e+00 : f32
    %8 = vector.broadcast %cst_5 : f32 to vector<1x128xf32>
    %9 = arith.divf %7, %8 : vector<1x128xf32>
    %10 = arith.mulf %5, %5 : vector<8x128xf32>
    %cst_6 = arith.constant dense<0.000000e+00> : vector<128xf32>
    %11 = vector.multi_reduction <add>, %10, %cst_6 [0] : vector<8x128xf32> to vector<128xf32>
    %12 = vector.shape_cast %11 : vector<128xf32> to vector<1x128xf32>
    %cst_7 = arith.constant 8.000000e+00 : f32
    %13 = vector.broadcast %cst_7 : f32 to vector<1x128xf32>
    %14 = arith.divf %12, %13 : vector<1x128xf32>
    %15 = arith.mulf %9, %9 : vector<1x128xf32>
    %16 = arith.subf %14, %15 : vector<1x128xf32>
    %cst_8 = arith.constant 0.000000e+00 : f32
    %17 = vector.broadcast %cst_8 : f32 to vector<1x128xf32>
    %18 = arith.maximumf %16, %17 : vector<1x128xf32>
    %c0_9 = arith.constant 0 : index
    %c0_10 = arith.constant 0 : index
    %19 = vector.load %arg3[%c0_9, %c0_10] : memref<1x128xf32, #tpu.memory_space<vmem>>, vector<1x128xf32>
    %cst_11 = arith.constant 9.99999974E-6 : f32
    %20 = vector.broadcast %cst_11 : f32 to vector<1x128xf32>
    %21 = arith.addf %18, %20 : vector<1x128xf32>
    %22 = math.rsqrt %21 : vector<1x128xf32>
    %23 = arith.mulf %19, %22 : vector<1x128xf32>
    %c0_12 = arith.constant 0 : index
    %c0_13 = arith.constant 0 : index
    %24 = vector.load %arg4[%c0_12, %c0_13] : memref<1x128xf32, #tpu.memory_space<vmem>>, vector<1x128xf32>
    %25 = arith.mulf %9, %23 : vector<1x128xf32>
    %26 = arith.subf %24, %25 : vector<1x128xf32>
    %27 = vector.broadcast %23 : vector<1x128xf32> to vector<8x128xf32>
    %28 = arith.mulf %5, %27 : vector<8x128xf32>
    %29 = vector.broadcast %26 : vector<1x128xf32> to vector<8x128xf32>
    %30 = arith.addf %28, %29 : vector<8x128xf32>
    %cst_14 = arith.constant 0.000000e+00 : f32
    %31 = vector.broadcast %cst_14 : f32 to vector<8x128xf32>
    %32 = arith.maximumf %30, %31 : vector<8x128xf32>
    %c0_15 = arith.constant 0 : index
    %c0_16 = arith.constant 0 : index
    %33 = vector.load %arg8[%c0_15, %c0_16] : memref<8x128xf32, #tpu.memory_space<vmem>>, vector<8x128xf32>
    %34 = arith.truncf %32 : vector<8x128xf32> to vector<8x128xbf16>
    %c0_17 = arith.constant 0 : index
    %c0_18 = arith.constant 0 : index
    %35 = vector.load %arg5[%c0_17, %c0_18] : memref<128x128xbf16, #tpu.memory_space<vmem>>, vector<128x128xbf16>
    %cst_19 = arith.constant dense<0.000000e+00> : vector<8x128xf32>
    %36 = tpu.matmul %34, %35, %cst_19 {dimension_numbers = #tpu.dot_dimension_numbers<[1], [0], [0], [1], [0, 0, 1, 1], [], []>} : vector<8x128xbf16>, vector<128x128xbf16>, vector<8x128xf32> -> vector<8x128xf32>
    %37 = arith.addf %33, %36 : vector<8x128xf32>
    %c0_20 = arith.constant 0 : index
    %c0_21 = arith.constant 0 : index
    %38 = vector.load %arg8[%c0_20, %c0_21] : memref<8x128xf32, #tpu.memory_space<vmem>>, vector<8x128xf32>
    tpu.vector_store %arg8[%c0_20, %c0_21], %37 {strides = array<i32>} : memref<8x128xf32, #tpu.memory_space<vmem>>, vector<8x128xf32>,
    %c0_i32_22 = arith.constant 0 : i32
    %39 = arith.cmpi eq, %arg0, %c0_i32_22 : i32
    %40 = arith.extui %39 : i1 to i32
    %c0_i32_23 = arith.constant 0 : i32
    %41 = arith.cmpi ne, %40, %c0_i32_23 : i32
    scf.if %41 {
      %c0_24 = arith.constant 0 : index
      %c0_25 = arith.constant 0 : index
      %42 = vector.load %arg8[%c0_24, %c0_25] : memref<8x128xf32, #tpu.memory_space<vmem>>, vector<8x128xf32>
      %c0_26 = arith.constant 0 : index
      %c0_27 = arith.constant 0 : index
      %43 = vector.load %arg6[%c0_26, %c0_27] : memref<1x128xf32, #tpu.memory_space<vmem>>, vector<1x128xf32>
      %44 = vector.broadcast %43 : vector<1x128xf32> to vector<8x128xf32>
      %45 = arith.addf %42, %44 : vector<8x128xf32>
      %c0_28 = arith.constant 0 : index
      %c0_29 = arith.constant 0 : index
      %46 = vector.load %arg7[%c0_28, %c0_29] : memref<8x128xf32, #tpu.memory_space<vmem>>, vector<8x128xf32>
      tpu.vector_store %arg7[%c0_28, %c0_29], %45 {strides = array<i32>} : memref<8x128xf32, #tpu.memory_space<vmem>>, vector<8x128xf32>,
    } else {
    }
    return
  }
  func.func @transform_0(%arg0: i32) -> (i32, i32) {
    %c0_i32 = arith.constant 0 : i32
    %c0_i32_0 = arith.constant 0 : i32
    %c0_i32_1 = arith.constant 0 : i32
    return %c0_i32, %c0_i32_0 : i32, i32
  }
  func.func @transform_1(%arg0: i32) -> (i32, i32) {
    %c0_i32 = arith.constant 0 : i32
    %c0_i32_0 = arith.constant 0 : i32
    return %c0_i32, %arg0 : i32, i32
  }
  func.func @transform_2(%arg0: i32) -> (i32, i32) {
    %c0_i32 = arith.constant 0 : i32
    %c0_i32_0 = arith.constant 0 : i32
    return %c0_i32, %arg0 : i32, i32
  }
  func.func @transform_3(%arg0: i32) -> (i32, i32) {
    %c0_i32 = arith.constant 0 : i32
    %c0_i32_0 = arith.constant 0 : i32
    return %c0_i32, %arg0 : i32, i32
  }
  func.func @transform_4(%arg0: i32) -> (i32, i32) {
    %c0_i32 = arith.constant 0 : i32
    %c0_i32_0 = arith.constant 0 : i32
    return %arg0, %c0_i32 : i32, i32
  }
  func.func @transform_5(%arg0: i32) -> (i32, i32) {
    %c0_i32 = arith.constant 0 : i32
    %c0_i32_0 = arith.constant 0 : i32
    %c0_i32_1 = arith.constant 0 : i32
    return %c0_i32, %c0_i32_0 : i32, i32
  }
  func.func @transform_6(%arg0: i32) -> (i32, i32) {
    %c0_i32 = arith.constant 0 : i32
    %c0_i32_0 = arith.constant 0 : i32
    %c0_i32_1 = arith.constant 0 : i32
    return %c0_i32, %c0_i32_0 : i32, i32
  }
}

</mosaic_0001>

<bundles_post_ra>
// kernel: mlp_forward.1
= control target key start
LH: loop header
LB: loop body
LE: loop exit
PB: predicated region body
PF: predicated region fallthrough
CT: control target
= control target key end

     0   :  { %v429_v1 = vmov 0.0   ;;  %vm430_vm0 = vmmov 0   ;;  %s530_s0 = inlined_call_operand.vmem [shape: bf16[8,128], index: 0, kind: input, shape index: {}]   ;;  %s531_s1 = inlined_call_operand.vmem [shape: bf16[128,128], index: 1, kind: input, shape index: {}]   ;;  %s532_s2 = inlined_call_operand.vmem [shape: f32[1,128], index: 2, kind: input, shape index: {}]   ;;  %s533_s3 = inlined_call_operand.vmem [shape: f32[1,128], index: 3, kind: input, shape index: {}]   ;;  %s534_s4 = inlined_call_operand.vmem [shape: bf16[128,128], index: 4, kind: input, shape index: {}]   ;;  %s535_s5 = inlined_call_operand.vmem [shape: f32[1,128], index: 5, kind: input, shape index: {}]   ;;  %s536_s6 = inlined_call_operand.hbm [shape: f32[8,128], index: 6, kind: output, shape index: {}]  }
   0x1   :  { %v389_v0 = vld [vmem:[%s531_s1 + $0x38] sm:$0xff]   ;;  %346 = vmatprep.subr.bf16.mxu0 %v429_v1  ;;  %366 = vmatprep.subr.bf16.mxu1 %v429_v1  ;;  %v390_v2 = vld [vmem:[%s531_s1 + $0x30] sm:$0xff]   ;;  %v391_v3 = vld [vmem:[%s531_s1 + $0x28] sm:$0xff]  }
   0x2   :  { %347 = vmatpush3.bf16.msra.mxu0 %v389_v0  ;;  %362 = vmatprep.mubr.msk.bf16.mxu0 %vm430_vm0, %v429_v1  ;;  %v392_v4 = vld [vmem:[%s531_s1 + $0x20] sm:$0xff]  }
   0x3   :  { %348 = vmatprep.subr.bf16.mxu0 %v429_v1  ;;  %382 = vmatprep.mubr.msk.bf16.mxu1 %vm430_vm0, %v429_v1 }
   0x6   :  { %349 = vmatpush3.bf16.msra.mxu0 %v390_v2 }
   0x7   :  { %350 = vmatprep.subr.bf16.mxu0 %v429_v1 }
   0xa   :  { %351 = vmatpush3.bf16.msra.mxu0 %v391_v3 }
   0xb   :  { %352 = vmatprep.subr.bf16.mxu0 %v429_v1 }
   0xc   :  { %11 = vsyncpa [#allocation4], 0  ;;  %v393_v5 = vld [vmem:[%s531_s1 + $0x18] sm:$0xff]   ;;  %v394_v6 = vld [vmem:[%s531_s1 + $0x10] sm:$0xff]   ;;  %v162_v41 = vlaneseq }
   0xd   :  { %v395_v7 = vld [vmem:[%s531_s1 + $0x8] sm:$0xff]   ;;  %v396_v8 = vld [vmem:[%s531_s1] sm:$0xff]   ;;  %v397_v10 = vld [vmem:[%s534_s4 + $0x38] sm:$0xff]  }
   0xe   :  { %353 = vmatpush3.bf16.msra.mxu0 %v392_v4  ;;  %v30_v9 = vld [vmem:[%s530_s0] sm:$0xf]  ;;  %367 = vmatpush3.bf16.msra.mxu1 %v397_v10  ;;  %v398_v11 = vld [vmem:[%s534_s4 + $0x30] sm:$0xff]   ;;  %v399_v12 = vld [vmem:[%s534_s4 + $0x28] sm:$0xff]   ;;  %v163_v42 = vshrl.u32 %v162_v41, 7 }
   0xf   :  { %354 = vmatprep.subr.bf16.mxu0 %v429_v1  ;;  %368 = vmatprep.subr.bf16.mxu1 %v429_v1  ;;  %v400_v13 = vld [vmem:[%s534_s4 + $0x20] sm:$0xff]   ;;  %v401_v14 = vld [vmem:[%s534_s4 + $0x18] sm:$0xff]   ;;  %v402_v15 = vld [vmem:[%s534_s4 + $0x10] sm:$0xff]  }
  0x10   :  { %v403_v16 = vld [vmem:[%s534_s4 + $0x8] sm:$0xff]   ;;  %v404_v17 = vld [vmem:[%s534_s4] sm:$0xff]   ;;  %v164_v44 = vsub.s32 0, %v163_v42 }
  0x11   :  { %v154_v43 = vld [vmem:[%s532_s2] sm:$0x1]  ;;  %s431_s2 = smov [#allocation3]  }
  0x12   :  { %355 = vmatpush3.bf16.msra.mxu0 %v393_v5  ;;  %369 = vmatpush3.bf16.msra.mxu1 %v398_v11  ;;  %v158_v47 = vld [vmem:[%s533_s3] sm:$0x1]  ;;  %s303_s10 = sshll.u32 %s431_s2, 4  ;;  %s304_s10 = int_to_ptr.vmem [resolvable:$true] %s303_s10 }
  0x13   :  { %356 = vmatprep.subr.bf16.mxu0 %v429_v1  ;;  %370 = vmatprep.subr.bf16.mxu1 %v429_v1  ;;  %v327_v56 = vld [vmem:[%s535_s5] ss:$0 sm:$0xff]  ;;  %s407_s3 = scalar_lea.vmem %s304_s10, 128  ;;  %p412_p1 = scmp.lt.s32.totalorder %s304_s10, %s304_s10 }
  0x14   :  { %p408_p0 = scmp.ne.s32.totalorder %s304_s10, %s407_s3  ;;  %p413_p2 = scmp.lt.s32.totalorder %s407_s3, %s407_s3 }
  0x16   :  { %357 = vmatpush3.bf16.msra.mxu0 %v394_v6  ;;  %371 = vmatpush3.bf16.msra.mxu1 %v399_v12  ;;  %p414_p3 = por %p413_p2, %p412_p1 }
  0x17   :  { %358 = vmatprep.subr.bf16.mxu0 %v429_v1  ;;  %372 = vmatprep.subr.bf16.mxu1 %v429_v1 }
  0x18   :  { %p415_p4 = pnand %p414_p3, %p408_p0 }
  0x1a   :  { %359 = vmatpush3.bf16.msra.mxu0 %v395_v7  ;;  %373 = vmatpush3.bf16.msra.mxu1 %v400_v13 }
  0x1b   :  { %360 = vmatprep.subr.bf16.mxu0 %v429_v1  ;;  %374 = vmatprep.subr.bf16.mxu1 %v429_v1 }
  0x1e   :  { %361 = vmatpush3.bf16.msra.mxu0 %v396_v8  ;;  %375 = vmatpush3.bf16.msra.mxu1 %v401_v14 }
  0x1f   :  { %376 = vmatprep.subr.bf16.mxu1 %v429_v1 }
  0x21   :  { %363 = vmatmul.mubr.bf16.vlgmr.msra.gmra.mxu0 %v30_v9 }
  0x22   :  { %377 = vmatpush3.bf16.msra.mxu1 %v402_v15 }
  0x23   :  { %378 = vmatprep.subr.bf16.mxu1 %v429_v1 }
  0x26   :  { %379 = vmatpush3.bf16.msra.mxu1 %v403_v16 }
  0x27   :  { %380 = vmatprep.subr.bf16.mxu1 %v429_v1 }
  0x2a   :  { %381 = vmatpush3.bf16.msra.mxu1 %v404_v17 }
  0xe1   :  { %v129_v18 = vpop.f32.mrf.mxu0 }
  0xe2   :  { %v135_v19 = vrot.slane %v129_v18, 4  ;;  %v143_v20 = vmul.f32 %v129_v18, %v129_v18 }
  0xe3   :  { %v364_v21 = vpop.f32.mrf.mxu0 }
  0xe4   :  { %v136_v22 = vadd.f32 %v135_v19, %v129_v18  ;;  %v144_v23 = vrot.slane %v143_v20, 4 }
  0xe5   :  { %v132_v24 = vpop.f32.mrf.mxu0 }
  0xe6   :  { %v137_v25 = vrot.slane %v136_v22, 2  ;;  %v145_v26 = vadd.f32 %v144_v23, %v143_v20 }
  0xe7   :  { %v365_v27 = vpop.f32.mrf.mxu0 }
  0xe8   :  { %v138_v28 = vadd.f32 %v137_v25, %v136_v22  ;;  %v146_v29 = vrot.slane %v145_v26, 2 }
  0xea   :  { %v139_v30 = vrot.slane %v138_v28, 1  ;;  %v147_v31 = vadd.f32 %v146_v29, %v145_v26 }
  0xec   :  { %v140_v32 = vadd.f32 %v139_v30, %v138_v28  ;;  %v148_v33 = vrot.slane %v147_v31, 1 }
  0xee   :  { %v142_v34 = vmul.f32 0.125, %v140_v32  ;;  %v149_v35 = vadd.f32 %v148_v33, %v147_v31 }
  0xf0   :  { %v150_v36 = vmul.f32 0.125, %v149_v35  ;;  %v151_v37 = vmul.f32 %v142_v34, %v142_v34 }
  0xf2   :  { %v152_v38 = vsub.f32 %v150_v36, %v151_v37 }
  0xf4   :  { %v153_v39 = vmax.f32 %v152_v38, 0.0 }
  0xf6   :  { %v155_v40 = vadd.f32 1e-05, %v153_v39 }
  0xf8   :  { %405 = vrsqrt.f32 %v155_v40 }
 0x105   :  { %v406_v45 = vpop.eup %405 }
 0x106   :  { %v157_v46 = vmul.f32 %v406_v45, %v154_v43 }
 0x108   :  { %v165_v48 = vrot.slane %v157_v46, %v164_v44  ;;  %v159_v49 = vmul.f32 %v157_v46, %v142_v34 }
 0x10a   :  { %v160_v50 = vsub.f32 %v158_v47, %v159_v49  ;;  %v167_v51 = vmul.f32 %v165_v48, %v129_v18 }
 0x10c   :  { %v172_v52 = vrot.slane %v160_v50, %v164_v44 }
 0x10e   :  { %v174_v53 = vadd.f32 %v172_v52, %v167_v51 }
 0x110   :  { %v175_v54 = vmax.f32 %v174_v53, 0.0 }
 0x112   :  { %v177_v55 = vpack.c.bf16 %v175_v54, %v175_v54 }
 0x114   :  { %383 = vmatmul.mubr.bf16.vlgmr.msra.gmra.mxu1 %v177_v55 }
 0x1d4   :  { %v276_v57 = vpop.f32.mrf.mxu1 }
 0x1d5   :  { %v295_v58 = vadd.f32 %v327_v56, %v276_v57 }
 0x1d6   :  { %v384_v59 = vpop.f32.mrf.mxu1 }
 0x1d7   :  { %296 = vst [vmem:[#allocation3] sm:$0xff] %v295_v58 }
 0x1d8   :  { %v279_v60 = vpop.f32.mrf.mxu1 }
 0x1d9   :  { %418 = shalt.err (!%p415_p4)
}
 0x1da   :  { %306 = dma.vmem_to_hbm [thread:$0]  %s304_s10, 128, %s536_s6, [#allocation4]   ;;  %v385_v61 = vpop.f32.mrf.mxu1 }
 0x1db   :  { %427 = dma.done.wait [#allocation4], 128  }
 0x1dc   :  { %428 = vsyncadd [#allocation4], 4294967168 }
 0x1dd   :  { %310 = vsyncpa [#allocation4], 1 }

</bundles_post_ra>
